<compile_context>
chip_gen: v7x
topology: tpu7x:2x2x1
jax: 0.10.0
libtpu: 0.0.40
codegen_flags: <defaults>
</compile_context>

<pallas_src>
import functools
import math

import jax
import jax.numpy as jnp
from jax.experimental import pallas as pl
from jax.experimental.pallas import tpu as pltpu

_LANES = 128      # TPU lane width; also the fc1 hidden size in this module
_SUBLANES = 8


def _round_up(x, m):
    return ((x + m - 1) // m) * m


def _dqn_kernel(x_ref, p_ref, q_ref, a_ref, *, n_actions, w1_rows, hidden):
    """Fused DQN forward on one batch tile.

    x_ref : (TB, w1_rows)            augmented states: [state, 1, zero-pad]
    p_ref : (w1_rows + hidden + 8, 128) packed parameters
              rows [0, w1_rows)               : W1 rows, then b1 row, then zero pad
              rows [w1_rows, w1_rows + hidden) : W2 (lanes >= n_actions are zero)
              row  w1_rows + hidden            : b2 (lanes >= n_actions are zero)
    q_ref : (TB, 128)  lane-dense Q-value slab (valid lanes: [0, n_actions))
    a_ref : (TB, 1)    greedy action ids (int32)
    """
    x = x_ref[...]
    w1a = p_ref[0:w1_rows, :]                               # W1 + b1 (augmented)
    w2 = p_ref[w1_rows:w1_rows + hidden, :]                 # W2 (zero-padded lanes)
    b2 = p_ref[w1_rows + hidden:w1_rows + hidden + 1, :]    # (1, 128)

    # fc1 (+ bias folded into the matmul via the ones column) + ReLU.
    h = jnp.dot(x, w1a, preferred_element_type=jnp.float32)
    h = jnp.maximum(h, 0.0)

    # fc2 (+ bias on the VPU). Output kept lane-dense (full 128 lanes).
    q = jnp.dot(h.astype(w2.dtype), w2, preferred_element_type=jnp.float32)
    q = q + b2.astype(jnp.float32)
    q_ref[...] = q.astype(q_ref.dtype)

    # Fused greedy action: argmax over the valid action lanes (act() path).
    col = jax.lax.broadcasted_iota(jnp.int32, q.shape, 1)
    qm = jnp.where(col < n_actions, q, jnp.full_like(q, -jnp.inf))
    row_max = jnp.max(qm, axis=-1, keepdims=True)
    idx = jnp.where(qm == row_max, col, jnp.full_like(col, 2 ** 30))
    a_ref[...] = jnp.min(idx, axis=-1, keepdims=True).astype(jnp.int32)


def linear_dqn_forward(x, w1, b1, w2, b2, *, matmul_dtype=jnp.float32,
                       batch_tile=512):
    """Pallas forward: x (B, D_in) -> (Q-values (B, n_actions), greedy actions (B,)).

    Weights use the (in_features, out_features) layout (transpose of nn.Linear).
    """
    B, d_in = x.shape
    hidden, n_actions = w2.shape
    assert w1.shape == (d_in, hidden)
    assert hidden == _LANES, "fc1 hidden size is fixed at 128 in this module"
    assert n_actions <= _LANES

    # ---- pack all parameters into ONE buffer (single input DMA) -----------
    w1_rows = _round_up(d_in + 1, _SUBLANES)     # W1 rows + b1 row, sublane aligned
    p_rows = w1_rows + hidden + _SUBLANES
    params = jnp.zeros((p_rows, _LANES), jnp.float32)
    params = params.at[:d_in, :hidden].set(w1)
    params = params.at[d_in, :hidden].set(jnp.reshape(b1, (-1,)))
    params = params.at[w1_rows:w1_rows + hidden, :n_actions].set(w2)
    params = params.at[w1_rows + hidden, :n_actions].set(jnp.reshape(b2, (-1,)))
    params = params.astype(matmul_dtype)

    # ---- augment + pad the batch of states ---------------------------------
    b_pad = max(_SUBLANES, _round_up(B, _SUBLANES))
    tb = min(b_pad, batch_tile)
    b_pad = _round_up(b_pad, tb)
    n_blocks = b_pad // tb

    x_aug = jnp.zeros((b_pad, w1_rows), jnp.float32)
    x_aug = x_aug.at[:B, :d_in].set(x)
    x_aug = x_aug.at[:B, d_in].set(1.0)          # ones column -> adds b1 in the matmul
    x_aug = x_aug.astype(matmul_dtype)

    kernel = functools.partial(_dqn_kernel, n_actions=n_actions,
                               w1_rows=w1_rows, hidden=hidden)

    q_pad, a_pad = pl.pallas_call(
        kernel,
        out_shape=(jax.ShapeDtypeStruct((b_pad, _LANES), jnp.float32),
                   jax.ShapeDtypeStruct((b_pad, 1), jnp.int32)),
        grid=(n_blocks,),
        in_specs=[
            pl.BlockSpec((tb, w1_rows), lambda i: (i, 0)),      # states: tiled on batch
            pl.BlockSpec((p_rows, _LANES), lambda i: (0, 0)),   # params: resident
        ],
        out_specs=(
            pl.BlockSpec((tb, _LANES), lambda i: (i, 0)),       # lane-dense Q slab
            pl.BlockSpec((tb, 1), lambda i: (i, 0)),            # greedy actions
        ),
        compiler_params=pltpu.CompilerParams(
            dimension_semantics=("parallel",)),                 # shards across v7x TCs
    )(x_aug, params)

    return q_pad[:B, :n_actions], a_pad[:B, 0]


def init_params(key, input_dims, n_actions, hidden=128):
    """Deterministic PyTorch-style (uniform +/- 1/sqrt(fan_in)) Linear init."""
    k1, k2, k3, k4 = jax.random.split(key, 4)
    bound1 = 1.0 / math.sqrt(input_dims)
    bound2 = 1.0 / math.sqrt(hidden)
    # Stored already transposed to (in, out) for the kernel.
    w1 = jax.random.uniform(k1, (input_dims, hidden), jnp.float32, -bound1, bound1)
    b1 = jax.random.uniform(k2, (hidden,), jnp.float32, -bound1, bound1)
    w2 = jax.random.uniform(k3, (hidden, n_actions), jnp.float32, -bound2, bound2)
    b2 = jax.random.uniform(k4, (n_actions,), jnp.float32, -bound2, bound2)
    return w1, b1, w2, b2


if __name__ == "__main__":
    # CartPole-v1: observation dim = 4, actions = 2. Small batch of states.
    B, D_IN, N_ACTIONS = 8, 4, 2

    key = jax.random.PRNGKey(0)
    k_x, k_p = jax.random.split(key)
    x = jax.random.normal(k_x, (B, D_IN), jnp.float32)
    w1, b1, w2, b2 = init_params(k_p, D_IN, N_ACTIONS)

    # Reuse one jit-compiled callable across RL steps (per perf feedback).
    fwd = jax.jit(linear_dqn_forward)
    q, act = fwd(x, w1, b1, w2, b2)
    jax.block_until_ready((q, act))

    # Pure-JAX reference check (same math as the PyTorch forward).
    ref_q = jnp.maximum(x @ w1 + b1, 0.0) @ w2 + b2
    assert q.shape == (B, N_ACTIONS)
    assert act.shape == (B,)
    assert jnp.allclose(q, ref_q, atol=1e-4, rtol=1e-4)
    assert jnp.array_equal(act, jnp.argmax(q, axis=1))

    print("KERNEL_OK")
</pallas_src>

<mosaic_0001>
module attributes {stable_mosaic.version = 11 : i64} {
  func.func @_dqn_kernel(%arg0: i32, %arg1: memref<8x8xf32, #tpu.memory_space<vmem>>, %arg2: memref<144x128xf32, #tpu.memory_space<vmem>>, %arg3: memref<8x128xf32, #tpu.memory_space<vmem>>, %arg4: memref<8x1xi32, #tpu.memory_space<vmem>>) attributes {dimension_semantics = [#tpu.dimension_semantics<parallel>], iteration_bounds = array<i64: 1>, scalar_prefetch = 0 : i64, scratch_operands = 0 : i64, tpu.core_type = #tpu.core_type<tc>, window_params = [{transform_indices = @transform_0, window_bounds = array<i64: 8, 8>}, {pipeline_mode = #tpu.pipeline_mode<synchronous>, transform_indices = @transform_1, window_bounds = array<i64: 144, 128>}, {transform_indices = @transform_2, window_bounds = array<i64: 8, 128>}, {transform_indices = @transform_3, window_bounds = array<i64: 8, 1>}]} {
    %c0 = arith.constant 0 : index
    %c0_0 = arith.constant 0 : index
    %0 = vector.load %arg1[%c0, %c0_0] : memref<8x8xf32, #tpu.memory_space<vmem>>, vector<8x8xf32>
    %c0_1 = arith.constant 0 : index
    %c0_2 = arith.constant 0 : index
    %1 = vector.load %arg2[%c0_1, %c0_2] : memref<144x128xf32, #tpu.memory_space<vmem>>, vector<8x128xf32>
    %c8 = arith.constant 8 : index
    %c0_3 = arith.constant 0 : index
    %2 = vector.load %arg2[%c8, %c0_3] : memref<144x128xf32, #tpu.memory_space<vmem>>, vector<128x128xf32>
    %c136 = arith.constant 136 : index
    %c0_4 = arith.constant 0 : index
    %3 = vector.load %arg2[%c136, %c0_4] : memref<144x128xf32, #tpu.memory_space<vmem>>, vector<1x128xf32>
    %cst = arith.constant dense<0.000000e+00> : vector<8x128xf32>
    %4 = tpu.matmul %0, %1, %cst {dimension_numbers = #tpu.dot_dimension_numbers<[1], [0], [0], [1], [0, 0, 1, 1], [], []>} : vector<8x8xf32>, vector<8x128xf32>, vector<8x128xf32> -> vector<8x128xf32>
    %cst_5 = arith.constant 0.000000e+00 : f32
    %5 = vector.broadcast %cst_5 : f32 to vector<8x128xf32>
    %6 = arith.maximumf %4, %5 : vector<8x128xf32>
    %cst_6 = arith.constant dense<0.000000e+00> : vector<8x128xf32>
    %7 = tpu.matmul %6, %2, %cst_6 {dimension_numbers = #tpu.dot_dimension_numbers<[1], [0], [0], [1], [0, 0, 1, 1], [], []>} : vector<8x128xf32>, vector<128x128xf32>, vector<8x128xf32> -> vector<8x128xf32>
    %8 = vector.broadcast %3 : vector<1x128xf32> to vector<8x128xf32>
    %9 = arith.addf %7, %8 : vector<8x128xf32>
    %c0_7 = arith.constant 0 : index
    %c0_8 = arith.constant 0 : index
    %10 = vector.load %arg3[%c0_7, %c0_8] : memref<8x128xf32, #tpu.memory_space<vmem>>, vector<8x128xf32>
    tpu.vector_store %arg3[%c0_7, %c0_8], %9 {strides = array<i32>} : memref<8x128xf32, #tpu.memory_space<vmem>>, vector<8x128xf32>,
    %11 = tpu.iota {dimensions = array<i32: 1>} : vector<8x128xi32>
    %c2_i32 = arith.constant 2 : i32
    %12 = vector.broadcast %c2_i32 : i32 to vector<8x128xi32>
    %13 = arith.cmpi slt, %11, %12 : vector<8x128xi32>
    %cst_9 = arith.constant 0xFF800000 : f32
    %14 = vector.broadcast %cst_9 : f32 to vector<8x128xf32>
    %15 = arith.select %13, %9, %14 : vector<8x128xi1>, vector<8x128xf32>
    %cst_10 = arith.constant dense<0xFF800000> : vector<8xf32>
    %16 = vector.multi_reduction <maximumf>, %15, %cst_10 [1] : vector<8x128xf32> to vector<8xf32>
    %17 = vector.shape_cast %16 : vector<8xf32> to vector<8x1xf32>
    %18 = vector.broadcast %17 : vector<8x1xf32> to vector<8x128xf32>
    %19 = arith.cmpf oeq, %15, %18 : vector<8x128xf32>
    %c1073741824_i32 = arith.constant 1073741824 : i32
    %20 = vector.broadcast %c1073741824_i32 : i32 to vector<8x128xi32>
    %21 = arith.select %19, %11, %20 : vector<8x128xi1>, vector<8x128xi32>
    %cst_11 = arith.constant dense<2147483647> : vector<8xi32>
    %22 = vector.multi_reduction <minsi>, %21, %cst_11 [1] : vector<8x128xi32> to vector<8xi32>
    %23 = vector.shape_cast %22 : vector<8xi32> to vector<8x1xi32>
    %c0_12 = arith.constant 0 : index
    %c0_13 = arith.constant 0 : index
    %24 = vector.load %arg4[%c0_12, %c0_13] : memref<8x1xi32, #tpu.memory_space<vmem>>, vector<8x1xi32>
    tpu.vector_store %arg4[%c0_12, %c0_13], %23 {strides = array<i32>} : memref<8x1xi32, #tpu.memory_space<vmem>>, vector<8x1xi32>,
    return
  }
  func.func @transform_0(%arg0: i32) -> (i32, i32) {
    %c0_i32 = arith.constant 0 : i32
    %c0_i32_0 = arith.constant 0 : i32
    return %arg0, %c0_i32 : i32, i32
  }
  func.func @transform_1(%arg0: i32) -> (i32, i32) {
    %c0_i32 = arith.constant 0 : i32
    %c0_i32_0 = arith.constant 0 : i32
    %c0_i32_1 = arith.constant 0 : i32
    return %c0_i32, %c0_i32_0 : i32, i32
  }
  func.func @transform_2(%arg0: i32) -> (i32, i32) {
    %c0_i32 = arith.constant 0 : i32
    %c0_i32_0 = arith.constant 0 : i32
    return %arg0, %c0_i32 : i32, i32
  }
  func.func @transform_3(%arg0: i32) -> (i32, i32) {
    %c0_i32 = arith.constant 0 : i32
    %c0_i32_0 = arith.constant 0 : i32
    return %arg0, %c0_i32 : i32, i32
  }
}

</mosaic_0001>

<bundles_post_ra>
// kernel: linear_dqn_forward.1
= control target key start
LH: loop header
LB: loop body
LE: loop exit
PB: predicated region body
PF: predicated region fallthrough
CT: control target
= control target key end

     0   :  { %vm32_vm0 = vcmask 64512   ;;  %v302_v0 = vmov 0.0   ;;  %vm303_vm1 = vmmov 0   ;;  %v304_v4 = vmov 0.0|0.0   ;;  %s388_s1 = inlined_call_operand.vmem [shape: f32[144,128], index: 1, kind: input, shape index: {}]   ;;  %s389_s0 = inlined_call_operand.vmem [shape: f32[8,8], index: 0, kind: input, shape index: {}]   ;;  %s390_s2 = inlined_call_operand.vmem [shape: f32[8,128], index: 2, kind: output, shape index: {0}]   ;;  %s391_s3 = inlined_call_operand.vmem [shape: s32[8,1], index: 3, kind: output, shape index: {1}]  }
   0x1   :  { %235 = vmatprep.subr.mxu0 %v302_v0  ;;  %v14_v1 = vld [vmem:[%s388_s1] sm:$0xff]  ;;  %237 = vmatprep.mubr.msk.f32.mxu0 %vm303_vm1, %v302_v0  ;;  %v15_v3 = vld [vmem:[%s388_s1 + $0x8] sm:$0xff]  ;;  %v16_v5 = vld [vmem:[%s388_s1 + $0x10] sm:$0xff]  ;;  %v182_v31 = vlaneseq  ;;  %vm204_vm5 = vcmask 7168  }
   0x2   :  { %v13_v2 = vld [vmem:[%s389_s0] sm:$0xff]  ;;  %236 = vmatpush3.msra.mxu0 %v14_v1  ;;  %275 = vmatprep.subr.bf16.mxu1 %v304_v4  ;;  %v17_v6 = vld [vmem:[%s388_s1 + $0x18] sm:$0xff]  ;;  %v276_v8 = vpack.c.bf16 %v16_v5, %v15_v3  ;;  %v19_v10 = vld [vmem:[%s388_s1 + $0x28] sm:$0xff] }
   0x3   :  { %v18_v7 = vld [vmem:[%s388_s1 + $0x20] sm:$0xff]  ;;  %238 = vmatmul.mubr.msk.f32.vlgmr.msra.gmra.mrb[0].mxu0 %vm32_vm0, %v13_v2  ;;  %272 = vmatprep.mubr.msk.f32.mxu1 %vm303_vm1, %v302_v0  ;;  %v20_v11 = vld [vmem:[%s388_s1 + $0x30] sm:$0xff]  ;;  %v21_v13 = vld [vmem:[%s388_s1 + $0x38] sm:$0xff]  ;;  %v183_v32 = vand.u32 127, %v182_v31 }
   0x4   :  { %277 = vmatpush3.bf16.msra.mxu1 %v276_v8  ;;  %v279_v9 = vpack.c.bf16 %v18_v7, %v17_v6  ;;  %v282_v12 = vpack.c.bf16 %v20_v11, %v19_v10  ;;  %v22_v14 = vld [vmem:[%s388_s1 + $0x40] sm:$0xff]  ;;  %v23_v16 = vld [vmem:[%s388_s1 + $0x48] sm:$0xff]  ;;  %v24_v17 = vld [vmem:[%s388_s1 + $0x50] sm:$0xff] }
   0x5   :  { %278 = vmatprep.subr.bf16.mxu1 %v304_v4  ;;  %v285_v15 = vpack.c.bf16 %v22_v14, %v21_v13  ;;  %v288_v18 = vpack.c.bf16 %v24_v17, %v23_v16  ;;  %v25_v19 = vld [vmem:[%s388_s1 + $0x58] sm:$0xff]  ;;  %v26_v20 = vld [vmem:[%s388_s1 + $0x60] sm:$0xff]  ;;  %v27_v22 = vld [vmem:[%s388_s1 + $0x68] sm:$0xff]  ;;  %vm184_vm2 = vcmp.lt.s32.totalorder %v183_v32, 2 }
   0x6   :  { %v291_v21 = vpack.c.bf16 %v26_v20, %v25_v19  ;;  %v28_v23 = vld [vmem:[%s388_s1 + $0x70] sm:$0xff]  ;;  %v29_v25 = vld [vmem:[%s388_s1 + $0x78] sm:$0xff]  ;;  %v30_v26 = vld [vmem:[%s388_s1 + $0x80] sm:$0xff] }
   0x7   :  { %v294_v24 = vpack.c.bf16 %v28_v23, %v27_v22  ;;  %v297_v27 = vpack.c.bf16 %v30_v26, %v29_v25  ;;  %v215_v33 = vld [vmem:[%s388_s1 + $0x88] ss:$0 sm:$0xff] }
   0x8   :  { %280 = vmatpush3.bf16.msra.mxu1 %v279_v9 }
   0x9   :  { %281 = vmatprep.subr.bf16.mxu1 %v304_v4 }
   0xc   :  { %283 = vmatpush3.bf16.msra.mxu1 %v282_v12 }
   0xd   :  { %284 = vmatprep.subr.bf16.mxu1 %v304_v4 }
  0x10   :  { %286 = vmatpush3.bf16.msra.mxu1 %v285_v15 }
  0x11   :  { %287 = vmatprep.subr.bf16.mxu1 %v304_v4 }
  0x14   :  { %289 = vmatpush3.bf16.msra.mxu1 %v288_v18 }
  0x15   :  { %290 = vmatprep.subr.bf16.mxu1 %v304_v4 }
  0x18   :  { %292 = vmatpush3.bf16.msra.mxu1 %v291_v21 }
  0x19   :  { %293 = vmatprep.subr.bf16.mxu1 %v304_v4 }
  0x1c   :  { %295 = vmatpush3.bf16.msra.mxu1 %v294_v24 }
  0x1d   :  { %296 = vmatprep.subr.bf16.mxu1 %v304_v4 }
  0x20   :  { %298 = vmatpush3.bf16.msra.mxu1 %v297_v27 }
  0xd6   :  { %v102_v28 = vpop.f32.mrb[0].mxu0 }
  0xd7   :  { %v106_v29 = vmax.f32 %v102_v28, 0.0  ;;  %v239_v30 = vpop.f32.mrb[1].mxu0 }
  0xd9   :  { %273 = vmatmul.mubr.f32.vlgmr.msra.gmra.mrb[0].mxu1 %v106_v29 }
 0x1ac   :  { %v177_v34 = vpop.f32.mrb[0].mxu1 }
 0x1ad   :  { %v178_v35 = vadd.f32 %v215_v33, %v177_v34  ;;  %v274_v36 = vpop.f32.mrb[1].mxu1 }
 0x1af   :  { %181 = vst [vmem:[%s390_s2] sm:$0xff] %v178_v35  ;;  %v185_v37 = vsel %vm184_vm2, %v178_v35, -inf }
 0x1b0   :  { %186 = vmax.xlane.f32.xlu0 %v185_v37 }
 0x23d   :  { %v187_v38 = vpop.xlane.xlu0 %186 }
 0x23e   :  { %vm188_vm3 = vcmp.eq.f32.partialorder %v185_v37, %v187_v38 }
 0x23f   :  { %v189_v39 = vsel %vm188_vm3, %v183_v32, 1073741824 }
 0x240   :  { %v191_v40 = vshra.s32 %v189_v39, 16  ;;  %v190_v42 = vand.u32 65535, %v189_v39 }
 0x242   :  { %v193_v41 = vcvt.s32.f32 %v191_v40  ;;  %v192_v44 = vcvt.s32.f32 %v190_v42 }
 0x244   :  { %194 = vmin.xlane.f32.xlu0 %v193_v41 }
 0x2d1   :  { %v195_v43 = vpop.xlane.xlu0 %194 }
 0x2d2   :  { %vm196_vm4 = vcmp.eq.f32.partialorder %v193_v41, %v195_v43  ;;  %v201_v46 = vcvt.f32.s32 %v195_v43 }
 0x2d3   :  { %v197_v45 = vsel %vm196_vm4, %v192_v44, inf }
 0x2d4   :  { %198 = vmin.xlane.f32.xlu1 %v197_v45  ;;  %v202_v48 = vshll.u32 %v201_v46, 16 }
 0x361   :  { %v199_v47 = vpop.xlane.xlu1 %198 }
 0x362   :  { %v200_v49 = vcvt.f32.s32 %v199_v47 }
 0x364   :  { %v203_v50 = vadd.s32 %v202_v48, %v200_v49 }
 0x366   :  { %205 = vst.msk [vmem:[%s391_s3] sm:$0xff] %vm204_vm5, %v203_v50 }

</bundles_post_ra>
